<compile_context>
chip_gen: v6e
topology: v6e:2x2x1
jax: 0.10.0
libtpu: 0.0.40
codegen_flags: <defaults>
</compile_context>

<pallas_src>
import functools

import jax
import jax.numpy as jnp
from jax.experimental import pallas as pl
from jax.experimental.pallas import tpu as pltpu


def _round_up(x, m):
    return ((x + m - 1) // m) * m


def _gelu_tanh(x):
    # GELU(approximate='tanh'): 0.5*x*(1 + tanh(sqrt(2/pi)*(x + 0.044715*x^3)))
    c = 0.7978845608028654  # sqrt(2/pi)
    return 0.5 * x * (1.0 + jnp.tanh(c * (x + 0.044715 * x * x * x)))


_VMEM_LIMIT = None


def _vmem_limit_bytes():
    """Per-generation VMEM cap with headroom for compiler scratch / buffers."""
    global _VMEM_LIMIT
    if _VMEM_LIMIT is None:
        try:
            cap = int(pltpu.get_tpu_info().vmem_capacity_bytes)
        except Exception:
            cap = 64 * 1024 * 1024  # conservative fallback (v7x-sized)
        _VMEM_LIMIT = min((cap * 3) // 4, 100 * 1024 * 1024)
    return _VMEM_LIMIT


def _ffn_kernel_f32out(x_ref, w1_ref, b1_ref, w2_ref, b2_ref, o_ref, *, hk):
    """f32-output path: accumulate directly into the resident output block."""
    k = pl.program_id(1)

    @pl.when(k == 0)
    def _():
        o_ref[...] = jnp.zeros_like(o_ref)

    off = pl.multiple_of(k * hk, 128)
    xb = x_ref[...].astype(jnp.bfloat16)  # in-kernel cast (hidden under MXU)

    # fc1 slice: (tm, E_pad) @ (E_pad, hk) -> (tm, hk), f32 accumulation.
    h = jnp.dot(xb, w1_ref[:, pl.ds(off, hk)], preferred_element_type=jnp.float32)
    h = _gelu_tanh(h + b1_ref[:, pl.ds(off, hk)])  # f32 elementwise (VPU/EUP)

    # Partial c_proj: (tm, hk) @ (hk, E_pad) accumulated into the output block.
    o_ref[...] += jnp.dot(h.astype(jnp.bfloat16), w2_ref[pl.ds(off, hk), :],
                          preferred_element_type=jnp.float32)

    @pl.when(k == pl.num_programs(1) - 1)
    def _():
        o_ref[...] += b2_ref[...]


def _ffn_kernel_acc(x_ref, w1_ref, b1_ref, w2_ref, b2_ref, o_ref, acc_ref, *, hk):
    """Generic path (non-f32 outputs): f32 scratch accumulator + final cast."""
    k = pl.program_id(1)

    @pl.when(k == 0)
    def _():
        acc_ref[...] = jnp.zeros_like(acc_ref)

    off = pl.multiple_of(k * hk, 128)
    xb = x_ref[...].astype(jnp.bfloat16)

    h = jnp.dot(xb, w1_ref[:, pl.ds(off, hk)], preferred_element_type=jnp.float32)
    h = _gelu_tanh(h + b1_ref[:, pl.ds(off, hk)])
    acc_ref[...] += jnp.dot(h.astype(jnp.bfloat16), w2_ref[pl.ds(off, hk), :],
                            preferred_element_type=jnp.float32)

    @pl.when(k == pl.num_programs(1) - 1)
    def _():
        o_ref[...] = (acc_ref[...] + b2_ref[...]).astype(o_ref.dtype)


@functools.partial(jax.jit, static_argnames=("tm_target", "hk_target"))
def ffn_pallas(x, w1, b1, w2, b2, *, tm_target=512, hk_target=1024):
    """x: (B, S, E); w1: (E, H); b1: (H,); w2: (H, E); b2: (E,)."""
    B, S, E = x.shape
    H = w1.shape[1]
    M = B * S
    out_dtype = x.dtype
    compute_dtype = jnp.bfloat16

    # Lane-dense padding (multiples of 128 on lane axes), sublane-aligned tm.
    E_pad = _round_up(E, 128)
    H_pad = _round_up(H, 128)

    tm = min(tm_target, _round_up(M, 8))
    # Guarantee >= 2 M tiles so both v7x TensorCores get work (megacore sharding).
    if M > 8 and _round_up(M, tm) // tm < 2:
        tm = _round_up((M + 1) // 2, 8)
    M_pad = _round_up(M, tm)

    # hk: largest multiple of 128 <= min(hk_target, H_pad) that divides H_pad.
    hk = H_pad
    cap = min(hk_target, H_pad)
    for cand in range((cap // 128) * 128, 0, -128):
        if H_pad % cand == 0:
            hk = cand
            break
    num_k = H_pad // hk

    # x stays in its original dtype (cast to bf16 inside the kernel).
    x2 = jnp.pad(x.reshape(M, E), ((0, M_pad - M), (0, E_pad - E)))
    # Weights padded + pre-cast once (reused, DMA'd into VMEM exactly once).
    w1p = jnp.pad(w1, ((0, E_pad - E), (0, H_pad - H))).astype(compute_dtype)
    w2p = jnp.pad(w2, ((0, H_pad - H), (0, E_pad - E))).astype(compute_dtype)
    b1p = jnp.pad(b1, (0, H_pad - H)).reshape(1, H_pad).astype(jnp.float32)
    b2p = jnp.pad(b2, (0, E_pad - E)).reshape(1, E_pad).astype(jnp.float32)

    grid = (M_pad // tm, num_k)

    use_f32_out = out_dtype == jnp.float32
    if use_f32_out:
        kernel = functools.partial(_ffn_kernel_f32out, hk=hk)
        scratch_shapes = []
    else:
        kernel = functools.partial(_ffn_kernel_acc, hk=hk)
        scratch_shapes = [pltpu.VMEM((tm, E_pad), jnp.float32)]

    x_bytes = x2.size * x2.dtype.itemsize
    cost = pl.CostEstimate(
        flops=2 * 2 * M_pad * E_pad * H_pad,
        transcendentals=M_pad * H_pad,
        bytes_accessed=(x_bytes + w1p.size * 2 + w2p.size * 2
                        + b1p.size * 4 + b2p.size * 4
                        + M_pad * E_pad * jnp.dtype(out_dtype).itemsize),
    )

    out = pl.pallas_call(
        kernel,
        out_shape=jax.ShapeDtypeStruct((M_pad, E_pad), out_dtype),
        grid_spec=pltpu.PrefetchScalarGridSpec(
            num_scalar_prefetch=0,
            grid=grid,
            in_specs=[
                # X tile: streamed over M, reused across the H-reduction axis.
                pl.BlockSpec((tm, E_pad), lambda i, k: (i, 0)),
                # Full weights/biases with constant index_maps -> DMA'd once,
                # VMEM-resident for the whole grid; hk chunk sliced in-kernel.
                pl.BlockSpec((E_pad, H_pad), lambda i, k: (0, 0)),
                pl.BlockSpec((1, H_pad), lambda i, k: (0, 0)),
                pl.BlockSpec((H_pad, E_pad), lambda i, k: (0, 0)),
                pl.BlockSpec((1, E_pad), lambda i, k: (0, 0)),
            ],
            out_specs=pl.BlockSpec((tm, E_pad), lambda i, k: (i, 0)),
            scratch_shapes=scratch_shapes,
        ),
        compiler_params=pltpu.CompilerParams(
            dimension_semantics=("parallel", "arbitrary"),
            vmem_limit_bytes=_vmem_limit_bytes(),
        ),
        cost_estimate=cost,
    )(x2, w1p, b1p, w2p, b2p)

    return out[:M, :E].reshape(B, S, E)


def ffn_reference(x, w1, b1, w2, b2):
    h = _gelu_tanh(jnp.einsum("bse,eh->bsh", x, w1) + b1)
    return jnp.einsum("bsh,he->bse", h, w2) + b2


def _make_params(key, E, H):
    k1, kb1, k2, kb2 = jax.random.split(key, 4)
    w1 = jax.random.normal(k1, (E, H), dtype=jnp.float32) * 0.02
    b1 = jax.random.normal(kb1, (H,), dtype=jnp.float32) * 0.02
    w2 = jax.random.normal(k2, (H, E), dtype=jnp.float32) * 0.02
    b2 = jax.random.normal(kb2, (E,), dtype=jnp.float32) * 0.02
    return w1, b1, w2, b2


if __name__ == "__main__":
    key = jax.random.PRNGKey(0)

    # Case 1: small shapes matching the toy module config
    # (batch=2, seq=8, n_embd=32, n_hidden_layer_size=64).
    B, S, E, H = 2, 8, 32, 64
    kx, kp = jax.random.split(key)
    x = jax.random.normal(kx, (B, S, E), dtype=jnp.float32)
    w1, b1, w2, b2 = _make_params(kp, E, H)

    y = ffn_pallas(x, w1, b1, w2, b2)
    jax.block_until_ready(y)
    y_ref = ffn_reference(x, w1, b1, w2, b2)
    assert y.shape == (B, S, E)
    # bf16 matmul operands (f32 accumulation) -> slightly looser tolerance.
    assert jnp.allclose(y, y_ref, atol=2e-2, rtol=2e-2), "mismatch vs reference (case 1)"

    # Case 2: 128-aligned shapes exercising multiple M tiles and the
    # H-reduction accumulator path (2 M-tiles x 2 k-steps).
    B2, S2, E2, H2 = 2, 128, 128, 256
    kx2, kp2 = jax.random.split(kp)
    x2 = jax.random.normal(kx2, (B2, S2, E2), dtype=jnp.float32)
    w1b, b1b, w2b, b2b = _make_params(kp2, E2, H2)

    y2 = ffn_pallas(x2, w1b, b1b, w2b, b2b, tm_target=128, hk_target=128)
    jax.block_until_ready(y2)
    y2_ref = ffn_reference(x2, w1b, b1b, w2b, b2b)
    assert y2.shape == (B2, S2, E2)
    assert jnp.allclose(y2, y2_ref, atol=2e-2, rtol=2e-2), "mismatch vs reference (case 2)"

    print("KERNEL_OK")
</pallas_src>

<mosaic_0001>
module attributes {stable_mosaic.version = 11 : i64} {
  func.func @_ffn_kernel_f32out(%arg0: i32, %arg1: i32, %arg2: memref<8x128xf32, #tpu.memory_space<vmem>>, %arg3: memref<128x128xbf16, #tpu.memory_space<vmem>>, %arg4: memref<1x128xf32, #tpu.memory_space<vmem>>, %arg5: memref<128x128xbf16, #tpu.memory_space<vmem>>, %arg6: memref<1x128xf32, #tpu.memory_space<vmem>>, %arg7: memref<8x128xf32, #tpu.memory_space<vmem>>) attributes {dimension_semantics = [#tpu.dimension_semantics<parallel>, #tpu.dimension_semantics<arbitrary>], iteration_bounds = array<i64: 2, 1>, scalar_prefetch = 0 : i64, scratch_operands = 0 : i64, tpu.core_type = #tpu.core_type<tc>, window_params = [{transform_indices = @transform_0, window_bounds = array<i64: 8, 128>}, {pipeline_mode = #tpu.pipeline_mode<synchronous>, transform_indices = @transform_1, window_bounds = array<i64: 128, 128>}, {pipeline_mode = #tpu.pipeline_mode<synchronous>, transform_indices = @transform_2, window_bounds = array<i64: 1, 128>}, {pipeline_mode = #tpu.pipeline_mode<synchronous>, transform_indices = @transform_3, window_bounds = array<i64: 128, 128>}, {pipeline_mode = #tpu.pipeline_mode<synchronous>, transform_indices = @transform_4, window_bounds = array<i64: 1, 128>}, {transform_indices = @transform_5, window_bounds = array<i64: 8, 128>}]} {
    %c0_i32 = arith.constant 0 : i32
    %0 = arith.cmpi eq, %arg1, %c0_i32 : i32
    %1 = arith.extui %0 : i1 to i32
    %c0_i32_0 = arith.constant 0 : i32
    %2 = arith.cmpi ne, %1, %c0_i32_0 : i32
    scf.if %2 {
      %cst_16 = arith.constant 0.000000e+00 : f32
      %37 = vector.broadcast %cst_16 : f32 to vector<8x128xf32>
      %c0_17 = arith.constant 0 : index
      %c0_18 = arith.constant 0 : index
      %38 = vector.load %arg7[%c0_17, %c0_18] : memref<8x128xf32, #tpu.memory_space<vmem>>, vector<8x128xf32>
      tpu.vector_store %arg7[%c0_17, %c0_18], %37 {strides = array<i32>} : memref<8x128xf32, #tpu.memory_space<vmem>>, vector<8x128xf32>,
    } else {
    }
    %c128_i32 = arith.constant 128 : i32
    %3 = arith.muli %arg1, %c128_i32 : i32
    %4 = tpu.assume_multiple %3, 128 : i32
    %c0 = arith.constant 0 : index
    %c0_1 = arith.constant 0 : index
    %5 = vector.load %arg2[%c0, %c0_1] : memref<8x128xf32, #tpu.memory_space<vmem>>, vector<8x128xf32>
    %6 = arith.truncf %5 : vector<8x128xf32> to vector<8x128xbf16>
    %c0_2 = arith.constant 0 : index
    %7 = arith.index_cast %4 : i32 to index
    %8 = vector.load %arg3[%c0_2, %7] : memref<128x128xbf16, #tpu.memory_space<vmem>>, vector<128x128xbf16>
    %cst = arith.constant dense<0.000000e+00> : vector<8x128xf32>
    %9 = tpu.matmul %6, %8, %cst {dimension_numbers = #tpu.dot_dimension_numbers<[1], [0], [0], [1], [0, 0, 1, 1], [], []>} : vector<8x128xbf16>, vector<128x128xbf16>, vector<8x128xf32> -> vector<8x128xf32>
    %c0_3 = arith.constant 0 : index
    %10 = arith.index_cast %4 : i32 to index
    %11 = vector.load %arg4[%c0_3, %10] : memref<1x128xf32, #tpu.memory_space<vmem>>, vector<1x128xf32>
    %12 = vector.broadcast %11 : vector<1x128xf32> to vector<8x128xf32>
    %13 = arith.addf %9, %12 : vector<8x128xf32>
    %cst_4 = arith.constant 5.000000e-01 : f32
    %14 = vector.broadcast %cst_4 : f32 to vector<8x128xf32>
    %15 = arith.mulf %14, %13 : vector<8x128xf32>
    %cst_5 = arith.constant 4.471500e-02 : f32
    %16 = vector.broadcast %cst_5 : f32 to vector<8x128xf32>
    %17 = arith.mulf %16, %13 : vector<8x128xf32>
    %18 = arith.mulf %17, %13 : vector<8x128xf32>
    %19 = arith.mulf %18, %13 : vector<8x128xf32>
    %20 = arith.addf %13, %19 : vector<8x128xf32>
    %cst_6 = arith.constant 0.797884583 : f32
    %21 = vector.broadcast %cst_6 : f32 to vector<8x128xf32>
    %22 = arith.mulf %21, %20 : vector<8x128xf32>
    %23 = math.tanh %22 : vector<8x128xf32>
    %cst_7 = arith.constant 1.000000e+00 : f32
    %24 = vector.broadcast %cst_7 : f32 to vector<8x128xf32>
    %25 = arith.addf %24, %23 : vector<8x128xf32>
    %26 = arith.mulf %15, %25 : vector<8x128xf32>
    %c0_8 = arith.constant 0 : index
    %c0_9 = arith.constant 0 : index
    %27 = vector.load %arg7[%c0_8, %c0_9] : memref<8x128xf32, #tpu.memory_space<vmem>>, vector<8x128xf32>
    %28 = arith.truncf %26 : vector<8x128xf32> to vector<8x128xbf16>
    %29 = arith.index_cast %4 : i32 to index
    %c0_10 = arith.constant 0 : index
    %30 = vector.load %arg5[%29, %c0_10] : memref<128x128xbf16, #tpu.memory_space<vmem>>, vector<128x128xbf16>
    %cst_11 = arith.constant dense<0.000000e+00> : vector<8x128xf32>
    %31 = tpu.matmul %28, %30, %cst_11 {dimension_numbers = #tpu.dot_dimension_numbers<[1], [0], [0], [1], [0, 0, 1, 1], [], []>} : vector<8x128xbf16>, vector<128x128xbf16>, vector<8x128xf32> -> vector<8x128xf32>
    %32 = arith.addf %27, %31 : vector<8x128xf32>
    %c0_12 = arith.constant 0 : index
    %c0_13 = arith.constant 0 : index
    %33 = vector.load %arg7[%c0_12, %c0_13] : memref<8x128xf32, #tpu.memory_space<vmem>>, vector<8x128xf32>
    tpu.vector_store %arg7[%c0_12, %c0_13], %32 {strides = array<i32>} : memref<8x128xf32, #tpu.memory_space<vmem>>, vector<8x128xf32>,
    %c0_i32_14 = arith.constant 0 : i32
    %34 = arith.cmpi eq, %arg1, %c0_i32_14 : i32
    %35 = arith.extui %34 : i1 to i32
    %c0_i32_15 = arith.constant 0 : i32
    %36 = arith.cmpi ne, %35, %c0_i32_15 : i32
    scf.if %36 {
      %c0_16 = arith.constant 0 : index
      %c0_17 = arith.constant 0 : index
      %37 = vector.load %arg7[%c0_16, %c0_17] : memref<8x128xf32, #tpu.memory_space<vmem>>, vector<8x128xf32>
      %c0_18 = arith.constant 0 : index
      %c0_19 = arith.constant 0 : index
      %38 = vector.load %arg6[%c0_18, %c0_19] : memref<1x128xf32, #tpu.memory_space<vmem>>, vector<1x128xf32>
      %39 = vector.broadcast %38 : vector<1x128xf32> to vector<8x128xf32>
      %40 = arith.addf %37, %39 : vector<8x128xf32>
      %c0_20 = arith.constant 0 : index
      %c0_21 = arith.constant 0 : index
      %41 = vector.load %arg7[%c0_20, %c0_21] : memref<8x128xf32, #tpu.memory_space<vmem>>, vector<8x128xf32>
      tpu.vector_store %arg7[%c0_20, %c0_21], %40 {strides = array<i32>} : memref<8x128xf32, #tpu.memory_space<vmem>>, vector<8x128xf32>,
    } else {
    }
    return
  }
  func.func @transform_0(%arg0: i32, %arg1: i32) -> (i32, i32) {
    %c0_i32 = arith.constant 0 : i32
    %c0_i32_0 = arith.constant 0 : i32
    return %arg0, %c0_i32 : i32, i32
  }
  func.func @transform_1(%arg0: i32, %arg1: i32) -> (i32, i32) {
    %c0_i32 = arith.constant 0 : i32
    %c0_i32_0 = arith.constant 0 : i32
    %c0_i32_1 = arith.constant 0 : i32
    return %c0_i32, %c0_i32_0 : i32, i32
  }
  func.func @transform_2(%arg0: i32, %arg1: i32) -> (i32, i32) {
    %c0_i32 = arith.constant 0 : i32
    %c0_i32_0 = arith.constant 0 : i32
    %c0_i32_1 = arith.constant 0 : i32
    return %c0_i32, %c0_i32_0 : i32, i32
  }
  func.func @transform_3(%arg0: i32, %arg1: i32) -> (i32, i32) {
    %c0_i32 = arith.constant 0 : i32
    %c0_i32_0 = arith.constant 0 : i32
    %c0_i32_1 = arith.constant 0 : i32
    return %c0_i32, %c0_i32_0 : i32, i32
  }
  func.func @transform_4(%arg0: i32, %arg1: i32) -> (i32, i32) {
    %c0_i32 = arith.constant 0 : i32
    %c0_i32_0 = arith.constant 0 : i32
    %c0_i32_1 = arith.constant 0 : i32
    return %c0_i32, %c0_i32_0 : i32, i32
  }
  func.func @transform_5(%arg0: i32, %arg1: i32) -> (i32, i32) {
    %c0_i32 = arith.constant 0 : i32
    %c0_i32_0 = arith.constant 0 : i32
    return %arg0, %c0_i32 : i32, i32
  }
}

</mosaic_0001>

<bundles_post_ra>
// kernel: ffn_pallas.1
= control target key start
LH: loop header
LB: loop body
LE: loop exit
PB: predicated region body
PF: predicated region fallthrough
CT: control target
= control target key end

     0   :  { %s742_s18 = smov 0   ;;  %s744_s19 = smov 0   ;;  %s840_s0 = inlined_call_operand.vmem [shape: f32[16,128], index: 0, kind: input, shape index: {}]   ;;  %s841_s1 = inlined_call_operand.vmem [shape: bf16[128,128], index: 1, kind: input, shape index: {}]   ;;  %s842_s2 = inlined_call_operand.vmem [shape: f32[1,128], index: 2, kind: input, shape index: {}]   ;;  %s843_s3 = inlined_call_operand.vmem [shape: bf16[128,128], index: 3, kind: input, shape index: {}]   ;;  %s844_s4 = inlined_call_operand.vmem [shape: f32[1,128], index: 4, kind: input, shape index: {}]   ;;  %s845_s5 = inlined_call_operand.vmem [shape: f32[16,128], index: 5, kind: output, shape index: {}]  }
   0x1   :  { %s746_s20 = smov 0  }
   0x2 LB: > { %s27_s21 = sadd.s32 1, %s704_s19  ;;  %p561_p0 = scmp.ge.s32.totalorder %s708_s20, 1  ;;  %s708_s20 = sphi %s746_s20, %s15_s20   ;;  %s704_s19 = sphi %s744_s19, %s847_s19   ;;  %s700_s18 = sphi %s742_s18, %s846_s18  }
   0x3   : > { %p29_p1 = scmp.ge.s32.totalorder %s27_s21, 2  ;;  %p198_p2 = scmp.lt.s32.totalorder %s708_s20, 3 }
   0x5   : > { %s849_s21 = smov (%p29_p1, %s27_s21), 0  ;;  %p199_p3 = pnand %p561_p0, %p198_p2 }
   0x6   : > { %p224_p4 = scmp.lt.s32.totalorder (!%p199_p3), %s700_s18, 1 }
   0x7   : > { %202 = sbr.rel (%p199_p3) target bundleno = 469 (0x1d5), region = 40 }
   0xc   : > { %v668_v0 = vld [vmem:[%s841_s1 + $0x38] sm:$0xff]   ;;  %v710_v1 = vmov 0.0   ;;  %v669_v2 = vld [vmem:[%s841_s1 + $0x30] sm:$0xff]   ;;  %vm711_vm0 = vmmov 0   ;;  %v670_v3 = vld [vmem:[%s841_s1 + $0x28] sm:$0xff]   ;;  %s851_s18 = smov (!%p224_p4, %s700_s18), 1 }
   0xd   : > { %602 = vmatprep.subr.bf16.mxu0 %v710_v1  ;;  %622 = vmatprep.subr.bf16.mxu1 %v710_v1  ;;  %v671_v4 = vld [vmem:[%s841_s1 + $0x20] sm:$0xff]   ;;  %v672_v5 = vld [vmem:[%s841_s1 + $0x18] sm:$0xff]   ;;  %v673_v6 = vld [vmem:[%s841_s1 + $0x10] sm:$0xff]   ;;  %s562_s9 = sshll.u32 %s851_s18, 3 }
   0xe   : > { %603 = vmatpush3.bf16.msra.mxu0 %v668_v0  ;;  %618 = vmatprep.mubr.msk.bf16.mxu0 %vm711_vm0, %v710_v1  ;;  %v674_v7 = vld [vmem:[%s841_s1 + $0x8] sm:$0xff]   ;;  %s227_s14 = scalar_lea.vmem %s840_s0, %s562_s9  ;;  %v675_v8 = vld [vmem:[%s841_s1] sm:$0xff]   ;;  %v676_v11 = vld [vmem:[%s843_s3 + $0x38] sm:$0xff]   ;;  %s231_s23 = scalar_lea.vmem %s845_s5, %s562_s9 }
   0xf   : > { %604 = vmatprep.subr.bf16.mxu0 %v710_v1  ;;  %638 = vmatprep.mubr.msk.bf16.mxu1 %vm711_vm0, %v710_v1  ;;  %v239_v9 = vld [vmem:[%s227_s14] sm:$0xff]  ;;  %v677_v12 = vld [vmem:[%s843_s3 + $0x30] sm:$0xff]   ;;  %v678_v13 = vld [vmem:[%s843_s3 + $0x28] sm:$0xff]  }
  0x10   : > { %v240_v10 = vpack.c.bf16 %v239_v9, %v239_v9  ;;  %623 = vmatpush3.bf16.msra.mxu1 %v676_v11  ;;  %v679_v14 = vld [vmem:[%s843_s3 + $0x20] sm:$0xff]   ;;  %v680_v15 = vld [vmem:[%s843_s3 + $0x18] sm:$0xff]   ;;  %v681_v16 = vld [vmem:[%s843_s3 + $0x10] sm:$0xff]  }
  0x11   : > { %624 = vmatprep.subr.bf16.mxu1 %v710_v1  ;;  %v682_v17 = vld [vmem:[%s843_s3 + $0x8] sm:$0xff]   ;;  %v683_v18 = vld [vmem:[%s843_s3] sm:$0xff]  }
  0x12   : > { %605 = vmatpush3.bf16.msra.mxu0 %v669_v2  ;;  %v564_v19 = vld [vmem:[%s842_s2] ss:$0 sm:$0xff] }
  0x13   : > { %606 = vmatprep.subr.bf16.mxu0 %v710_v1  ;;  %v581_v36 = vld [vmem:[%s844_s4] ss:$0 sm:$0xff] }
  0x14   : > { %625 = vmatpush3.bf16.msra.mxu1 %v677_v12 }
  0x15   : > { %626 = vmatprep.subr.bf16.mxu1 %v710_v1 }
  0x16   : > { %607 = vmatpush3.bf16.msra.mxu0 %v670_v3 }
  0x17   : > { %608 = vmatprep.subr.bf16.mxu0 %v710_v1 }
  0x18   : > { %627 = vmatpush3.bf16.msra.mxu1 %v678_v13 }
  0x19   : > { %628 = vmatprep.subr.bf16.mxu1 %v710_v1 }
  0x1a   : > { %609 = vmatpush3.bf16.msra.mxu0 %v671_v4 }
  0x1b   : > { %610 = vmatprep.subr.bf16.mxu0 %v710_v1 }
  0x1c   : > { %629 = vmatpush3.bf16.msra.mxu1 %v679_v14 }
  0x1d   : > { %630 = vmatprep.subr.bf16.mxu1 %v710_v1 }
  0x1e   : > { %611 = vmatpush3.bf16.msra.mxu0 %v672_v5 }
  0x1f   : > { %612 = vmatprep.subr.bf16.mxu0 %v710_v1 }
  0x20   : > { %631 = vmatpush3.bf16.msra.mxu1 %v680_v15 }
  0x21   : > { %632 = vmatprep.subr.bf16.mxu1 %v710_v1 }
  0x22   : > { %613 = vmatpush3.bf16.msra.mxu0 %v673_v6 }
  0x23   : > { %614 = vmatprep.subr.bf16.mxu0 %v710_v1 }
  0x24   : > { %633 = vmatpush3.bf16.msra.mxu1 %v681_v16 }
  0x25   : > { %634 = vmatprep.subr.bf16.mxu1 %v710_v1 }
  0x26   : > { %615 = vmatpush3.bf16.msra.mxu0 %v674_v7 }
  0x27   : > { %616 = vmatprep.subr.bf16.mxu0 %v710_v1 }
  0x28   : > { %635 = vmatpush3.bf16.msra.mxu1 %v682_v17 }
  0x29   : > { %636 = vmatprep.subr.bf16.mxu1 %v710_v1 }
  0x2a   : > { %617 = vmatpush3.bf16.msra.mxu0 %v675_v8 }
  0x2c   : > { %637 = vmatpush3.bf16.msra.mxu1 %v683_v18 }
  0x2d   : > { %619 = vmatmul.mubr.bf16.vlgmr.msra.gmra.mxu0 %v240_v10 }
  0xed   : > { %v351_v20 = vpop.f32.mrf.mxu0 }
  0xee   : > { %v352_v21 = vadd.f32 %v564_v19, %v351_v20 }
  0xef   : > { %v620_v22 = vpop.f32.mrf.mxu0 }
  0xf0   : > { %v358_v23 = vmul.f32 0.044715, %v352_v21  ;;  %v357_v31 = vmul.f32 0.5, %v352_v21 }
  0xf1   : > { %v354_v24 = vpop.f32.mrf.mxu0 }
  0xf2   : > { %v359_v25 = vmul.f32 %v358_v23, %v352_v21 }
  0xf3   : > { %v621_v26 = vpop.f32.mrf.mxu0 }
  0xf4   : > { %v360_v27 = vmul.f32 %v359_v25, %v352_v21 }
  0xf6   : > { %v361_v28 = vadd.f32 %v360_v27, %v352_v21 }
  0xf8   : > { %v362_v29 = vmul.f32 0.7978846, %v361_v28 }
  0xfa   : > { %684 = vtanh.f32 %v362_v29 }
 0x107   : > { %v685_v30 = vpop.eup %684 }
 0x108   : > { %v364_v32 = vadd.f32 1.0, %v685_v30 }
 0x10a   : > { %v365_v33 = vmul.f32 %v364_v32, %v357_v31 }
 0x10c   : > { %v367_v34 = vpack.c.bf16 %v365_v33, %v365_v33 }
 0x10e   : > { %639 = vmatmul.mubr.bf16.vlgmr.msra.gmra.mxu1 %v367_v34 }
 0x1ce   : > { %v470_v35 = vpop.f32.mrf.mxu1 }
 0x1cf   : > { %v489_v38 = vadd.f32 %v581_v36, %v470_v35 }
 0x1d0   : > { %v640_v37 = vpop.f32.mrf.mxu1 }
 0x1d1   : > { %490 = vst [vmem:[%s231_s23] sm:$0xff] %v489_v38 }
 0x1d2   : > { %v473_v39 = vpop.f32.mrf.mxu1 }
 0x1d4   : > { %v641_v40 = vpop.f32.mrf.mxu1 }
 0x1d5 PF: > { %s15_s20 = sadd.s32 1, %s708_s20   ;;  %s846_s18 = smov %s704_s19 }
 0x1d6   : > { %p12_p5 = scmp.ge.s32.totalorder %s15_s20, 4   ;;  %s847_s19 = smov %s849_s21 }
 0x1d8   :  { %14 = sbr.rel (!%p12_p5) target bundleno = 2 (0x2), region = 81 }

</bundles_post_ra>
